<compile_context>
chip_gen: v5e
topology: v5e:2x2
jax: 0.10.0
libtpu: 0.0.40
codegen_flags: <defaults>
</compile_context>

<pallas_src>
import math

import jax
import jax.numpy as jnp
from jax.experimental import pallas as pl
from jax.experimental.pallas import tpu as pltpu

C_IN = 3
NUM_FEATURES = 16   # C_out
KSIZE = 3


def conv_relu_pool_kernel(lhs_ref, rhs_ref, b_ref, o_ref):
    """Fused conv3x3(pad=1) + bias + ReLU + 2x2 maxpool for one batch block.

    lhs_ref : (1, 2*Mt, K) bf16  im2col rows; first Mt rows are pool-row offset dh=0,
                                 last Mt rows dh=1 (Mt = Bt*H/2, K = 3*(W+2)*Cin).
    rhs_ref : (K, 2*N)     bf16  block-Toeplitz weights; first N cols are pool-col
                                 offset dw=0, last N cols dw=1 (N = (W/2)*Cout).
    b_ref   : (1, N)       f32   bias tiled over the pooled-W positions.
    o_ref   : (1, Mt, N)   f32   pooled output, lane-dense last dim (128 for W=16).
    """
    mt = o_ref.shape[1]
    n = o_ref.shape[2]

    # Single MXU matmul per grid step, f32 accumulation.
    y = jnp.dot(lhs_ref[0], rhs_ref[...], preferred_element_type=jnp.float32)  # (2*Mt, 2*N)

    # 2x2 max-pool == elementwise max of the four aligned quadrants (pure VPU, aligned
    # sublane/lane slices so no relayout).
    pooled = jnp.maximum(
        jnp.maximum(y[:mt, :n], y[:mt, n:]),
        jnp.maximum(y[mt:, :n], y[mt:, n:]),
    )

    # bias + ReLU (ReLU is monotone, so relu(max+bias) == max(relu(.+bias))); one
    # unmasked full-tile store per grid step.
    o_ref[0] = jnp.maximum(pooled + b_ref[...], 0.0)


def _pick_batch_tile(B):
    # Keep >= 2 grid steps when possible (megacore / v7x dual-TC) while still batching
    # several images per step to amortize the ~0.35us fixed pipeline overhead.
    target = max(1, B // 2)
    for cand in (8, 4, 2, 1):
        if cand <= target and B % cand == 0:
            return cand
    return 1


def simple_cnn_forward(x_nchw, w_oihw, bias):
    """Forward matching SimpleCNN: conv(3x3, pad=1) -> ReLU -> maxpool(2,2), NCHW in/out."""
    B, cin, H, W = x_nchw.shape
    cout = w_oihw.shape[0]
    assert cin == C_IN and cout == NUM_FEATURES
    assert H % 2 == 0 and W % 2 == 0

    Bt = _pick_batch_tile(B)
    NB = B // Bt
    Wp2 = W + 2
    K = KSIZE * Wp2 * cin          # 162 for W=16
    N = (W // 2) * cout            # 128 for W=16, Cout=16  -> lane-dense output
    Mt = Bt * (H // 2)

    f32 = jnp.float32
    # TODO(synk): for large H/W, fuse the pad/transpose/im2col glue below into the kernel
    # (manual DMA of row strips) instead of materializing it with separate XLA ops.

    # ---- input im2col (wrapper glue, tiny tensors) -------------------------------------
    x_nhwc = jnp.transpose(x_nchw, (0, 2, 3, 1)).astype(f32)            # (B, H, W, Cin)
    x_pad = jnp.pad(x_nhwc, ((0, 0), (1, 1), (1, 1), (0, 0)))           # (B, H+2, W+2, Cin)
    # strips[b, dh, i, kh, c, ci] = x_pad[b, 2*i + dh + kh, c, ci]
    strips = jnp.stack(
        [jnp.stack([x_pad[:, dh + kh: dh + kh + H - 1: 2] for kh in range(KSIZE)], axis=2)
         for dh in range(2)],
        axis=1)                                                          # (B, 2, H/2, 3, Wp2, Cin)
    lhs = strips.reshape(B, 2, H // 2, K)
    lhs = lhs.reshape(NB, Bt, 2, H // 2, K)
    lhs = jnp.transpose(lhs, (0, 2, 1, 3, 4))                            # (NB, 2, Bt, H/2, K)
    lhs = lhs.reshape(NB, 2 * Mt, K).astype(jnp.bfloat16)

    # ---- block-Toeplitz weight matrix ---------------------------------------------------
    w_hwio = jnp.transpose(w_oihw, (2, 3, 1, 0)).astype(f32)             # (3, 3, Cin, Cout)
    c_idx = jnp.arange(Wp2).reshape(1, 1, Wp2, 1)
    j_idx = jnp.arange(W // 2).reshape(1, 1, 1, W // 2)
    dw_idx = jnp.arange(2).reshape(2, 1, 1, 1)
    kw_idx = jnp.arange(KSIZE).reshape(1, KSIZE, 1, 1)
    sel = (c_idx == 2 * j_idx + dw_idx + kw_idx).astype(f32)             # (2, 3, Wp2, W/2)
    rhs6 = jnp.einsum('dkcj,hkio->dhcijo', sel, w_hwio)                  # (2, 3, Wp2, Cin, W/2, Cout)
    rhs = jnp.transpose(rhs6, (1, 2, 3, 0, 4, 5)).reshape(K, 2 * N)
    rhs = rhs.astype(jnp.bfloat16)

    bias_tiled = jnp.tile(bias.astype(f32), W // 2).reshape(1, N)

    grid_spec = pltpu.PrefetchScalarGridSpec(
        num_scalar_prefetch=0,
        grid=(NB,),
        in_specs=[
            pl.BlockSpec((1, 2 * Mt, K), lambda nb: (nb, 0, 0)),
            pl.BlockSpec((K, 2 * N), lambda nb: (0, 0)),   # resident: same block every step
            pl.BlockSpec((1, N), lambda nb: (0, 0)),
        ],
        out_specs=pl.BlockSpec((1, Mt, N), lambda nb: (nb, 0, 0)),
    )

    out = pl.pallas_call(
        conv_relu_pool_kernel,
        out_shape=jax.ShapeDtypeStruct((NB, Mt, N), f32),
        grid_spec=grid_spec,
        compiler_params=pltpu.CompilerParams(dimension_semantics=("parallel",)),
    )(lhs, rhs, bias_tiled)

    # (NB, Bt*H/2, (W/2)*Cout) -> (B, H/2, W/2, Cout) -> NCHW
    out = out.reshape(B, H // 2, W // 2, cout)
    return jnp.transpose(out, (0, 3, 1, 2))


def reference_forward(x_nchw, w_oihw, bias):
    y = jax.lax.conv_general_dilated(
        x_nchw, w_oihw, window_strides=(1, 1), padding=((1, 1), (1, 1)),
        dimension_numbers=("NCHW", "OIHW", "NCHW"))
    y = y + bias[None, :, None, None]
    y = jnp.maximum(y, 0.0)
    y = jax.lax.reduce_window(y, -jnp.inf, jax.lax.max,
                              (1, 1, 2, 2), (1, 1, 2, 2), "VALID")
    return y


if __name__ == "__main__":
    key = jax.random.PRNGKey(0)
    kx, kw = jax.random.split(key)

    B, H, W = 2, 16, 16
    x = jax.random.normal(kx, (B, C_IN, H, W), dtype=jnp.float32)

    # Deterministic Kaiming-normal init (fan_in, gain=sqrt(2)), zero bias, matching
    # nn.init.kaiming_normal_ / constant_(bias, 0) in shape & statistics.
    fan_in = C_IN * KSIZE * KSIZE
    std = math.sqrt(2.0 / fan_in)
    w = jax.random.normal(kw, (NUM_FEATURES, C_IN, KSIZE, KSIZE), dtype=jnp.float32) * std
    b = jnp.zeros((NUM_FEATURES,), dtype=jnp.float32)

    fwd = jax.jit(simple_cnn_forward)
    out = jax.block_until_ready(fwd(x, w, b))
    ref = reference_forward(x, w, b)

    assert out.shape == (B, NUM_FEATURES, H // 2, W // 2), out.shape
    # bf16 MXU inputs with f32 accumulation -> ~1e-2 worst-case absolute error expected.
    max_err = float(jnp.max(jnp.abs(out - ref)))
    assert jnp.allclose(out, ref, atol=3e-2, rtol=3e-2), max_err

    print("KERNEL_OK")
</pallas_src>

<mosaic_0001>
module attributes {stable_mosaic.version = 11 : i64} {
  func.func @conv_relu_pool_kernel(%arg0: i32, %arg1: memref<1x16x162xbf16, #tpu.memory_space<vmem>>, %arg2: memref<162x256xbf16, #tpu.memory_space<vmem>>, %arg3: memref<1x128xf32, #tpu.memory_space<vmem>>, %arg4: memref<1x8x128xf32, #tpu.memory_space<vmem>>) attributes {dimension_semantics = [#tpu.dimension_semantics<parallel>], iteration_bounds = array<i64: 2>, scalar_prefetch = 0 : i64, scratch_operands = 0 : i64, tpu.core_type = #tpu.core_type<tc>, window_params = [{transform_indices = @transform_0, window_bounds = array<i64: 1, 16, 162>}, {pipeline_mode = #tpu.pipeline_mode<synchronous>, transform_indices = @transform_1, window_bounds = array<i64: 162, 256>}, {pipeline_mode = #tpu.pipeline_mode<synchronous>, transform_indices = @transform_2, window_bounds = array<i64: 1, 128>}, {transform_indices = @transform_3, window_bounds = array<i64: 1, 8, 128>}]} {
    %c0 = arith.constant 0 : index
    %c0_0 = arith.constant 0 : index
    %c0_1 = arith.constant 0 : index
    %0 = vector.load %arg1[%c0, %c0_0, %c0_1] : memref<1x16x162xbf16, #tpu.memory_space<vmem>>, vector<1x16x162xbf16>
    %1 = vector.shape_cast %0 : vector<1x16x162xbf16> to vector<16x162xbf16>
    %c0_2 = arith.constant 0 : index
    %c0_3 = arith.constant 0 : index
    %2 = vector.load %arg2[%c0_2, %c0_3] : memref<162x256xbf16, #tpu.memory_space<vmem>>, vector<162x256xbf16>
    %cst = arith.constant dense<0.000000e+00> : vector<16x256xf32>
    %3 = tpu.matmul %1, %2, %cst {dimension_numbers = #tpu.dot_dimension_numbers<[1], [0], [0], [1], [0, 0, 1, 1], [], []>} : vector<16x162xbf16>, vector<162x256xbf16>, vector<16x256xf32> -> vector<16x256xf32>
    %4 = vector.extract_strided_slice %3 {offsets = [0, 0], sizes = [8, 128], strides = [1, 1]} : vector<16x256xf32> to vector<8x128xf32>
    %5 = vector.extract_strided_slice %3 {offsets = [0, 128], sizes = [8, 128], strides = [1, 1]} : vector<16x256xf32> to vector<8x128xf32>
    %6 = arith.maximumf %4, %5 : vector<8x128xf32>
    %7 = vector.extract_strided_slice %3 {offsets = [8, 0], sizes = [8, 128], strides = [1, 1]} : vector<16x256xf32> to vector<8x128xf32>
    %8 = vector.extract_strided_slice %3 {offsets = [8, 128], sizes = [8, 128], strides = [1, 1]} : vector<16x256xf32> to vector<8x128xf32>
    %9 = arith.maximumf %7, %8 : vector<8x128xf32>
    %10 = arith.maximumf %6, %9 : vector<8x128xf32>
    %c0_4 = arith.constant 0 : index
    %c0_5 = arith.constant 0 : index
    %11 = vector.load %arg3[%c0_4, %c0_5] : memref<1x128xf32, #tpu.memory_space<vmem>>, vector<1x128xf32>
    %12 = vector.broadcast %11 : vector<1x128xf32> to vector<8x128xf32>
    %13 = arith.addf %10, %12 : vector<8x128xf32>
    %cst_6 = arith.constant 0.000000e+00 : f32
    %14 = vector.broadcast %cst_6 : f32 to vector<8x128xf32>
    %15 = arith.maximumf %13, %14 : vector<8x128xf32>
    %c0_7 = arith.constant 0 : index
    %c0_8 = arith.constant 0 : index
    %c0_9 = arith.constant 0 : index
    %16 = vector.load %arg4[%c0_7, %c0_8, %c0_9] : memref<1x8x128xf32, #tpu.memory_space<vmem>>, vector<1x8x128xf32>
    %17 = vector.shape_cast %16 : vector<1x8x128xf32> to vector<8x128xf32>
    %18 = vector.shape_cast %15 : vector<8x128xf32> to vector<1x8x128xf32>
    tpu.vector_store %arg4[%c0_7, %c0_8, %c0_9], %18 {strides = array<i32>} : memref<1x8x128xf32, #tpu.memory_space<vmem>>, vector<1x8x128xf32>,
    return
  }
  func.func @transform_0(%arg0: i32) -> (i32, i32, i32) {
    %c0_i32 = arith.constant 0 : i32
    %c0_i32_0 = arith.constant 0 : i32
    %c0_i32_1 = arith.constant 0 : i32
    return %arg0, %c0_i32, %c0_i32_0 : i32, i32, i32
  }
  func.func @transform_1(%arg0: i32) -> (i32, i32) {
    %c0_i32 = arith.constant 0 : i32
    %c0_i32_0 = arith.constant 0 : i32
    %c0_i32_1 = arith.constant 0 : i32
    return %c0_i32, %c0_i32_0 : i32, i32
  }
  func.func @transform_2(%arg0: i32) -> (i32, i32) {
    %c0_i32 = arith.constant 0 : i32
    %c0_i32_0 = arith.constant 0 : i32
    %c0_i32_1 = arith.constant 0 : i32
    return %c0_i32, %c0_i32_0 : i32, i32
  }
  func.func @transform_3(%arg0: i32) -> (i32, i32, i32) {
    %c0_i32 = arith.constant 0 : i32
    %c0_i32_0 = arith.constant 0 : i32
    %c0_i32_1 = arith.constant 0 : i32
    return %arg0, %c0_i32, %c0_i32_0 : i32, i32, i32
  }
}

</mosaic_0001>

<bundles_post_ra>
// kernel: tile.8
= control target key start
LH: loop header
LB: loop body
LE: loop exit
PB: predicated region body
PF: predicated region fallthrough
CT: control target
= control target key end

     0   :  { %s22_s0 = inlined_call_operand.vmem [shape: f32[16], index: 0, kind: input, shape index: {}]   ;;  %s23_s1 = inlined_call_operand.vmem [shape: f32[8,16], index: 1, kind: output, shape index: {}]  }
   0x1   :  { %v4_v0 = vld [vmem:[%s22_s0] ss:$0 sm:$0xff] }
   0x2   :  { %5 = vst [vmem:[%s23_s1] sm:$0xff] %v4_v0 }

// kernel: tile.9
= control target key start
LH: loop header
LB: loop body
LE: loop exit
PB: predicated region body
PF: predicated region fallthrough
CT: control target
= control target key end

     0   :  { %s67_s10 = smov 112   ;;  %s68_s11 = smov 80   ;;  %vm3_vm0 = vcmask 130048   ;;  %vm9_vm1 = vcmask 1048448   ;;  %vm15_vm2 = vcmask 917248   ;;  %vm21_vm3 = vcmask 786048   ;;  %s111_s0 = inlined_call_operand.vmem [shape: f32[8,16], index: 0, kind: input, shape index: {}]   ;;  %s112_s1 = inlined_call_operand.vmem [shape: f32[1,128], index: 1, kind: output, shape index: {}]  }
   0x1   :  { %v53_v0 = vld [vmem:[%s111_s0 + $0x7] sm:$0x1]   ;;  %v55_v1 = vld [vmem:[%s111_s0 + $0x5] sm:$0x1]   ;;  %v57_v2 = vld [vmem:[%s111_s0 + $0x3] sm:$0x1]  }
   0x2   :  { %7 = vrot.lane.b32.xlu0 %v53_v0, %s67_s10  ;;  %19 = vrot.lane.b32.xlu1 %v55_v1, %s68_s11  ;;  %s69_s14 = smov 48   ;;  %v54_v3 = vld [vmem:[%s111_s0 + $0x6] sm:$0x1]   ;;  %v56_v4 = vld [vmem:[%s111_s0 + $0x4] sm:$0x1]   ;;  %s70_s21 = smov 96  }
   0x3   :  { %31 = vrot.lane.b32.xlu2 %v57_v2, %s69_s14  ;;  %v58_v5 = vld [vmem:[%s111_s0 + $0x2] sm:$0x1]   ;;  %s71_s22 = smov 64   ;;  %s72_s23 = smov 32   ;;  %v59_v6 = vld [vmem:[%s111_s0 + $0x1] sm:$0x1]  }
   0x4   :  { %s73_s26 = smov 16   ;;  %v2_v7 = vld [vmem:[%s111_s0] sm:$0x1]   ;;  %vm27_vm4 = vcmask 654848   ;;  %vm33_vm5 = vcmask 523648   ;;  %vm39_vm6 = vcmask 392448  }
   0x5   :  { %4 = vst.msk [vmem:[#allocation0] sm:$0x1] %vm3_vm0, %v2_v7   ;;  %vm45_vm7 = vcmask 261248  }
   0xa   :  { %13 = vrot.lane.b32.xlu0 %v54_v3, %s70_s21  ;;  %25 = vrot.lane.b32.xlu1 %v56_v4, %s71_s22 }
   0xb   :  { %37 = vrot.lane.b32.xlu2 %v58_v5, %s72_s23 }
  0x12   :  { %43 = vrot.lane.b32.xlu0 %v59_v6, %s73_s26 }
  0x5d   :  { %v32_v8 = vpop.permute.xlu2 %31  }
  0x65   :  { %v38_v9 = vpop.permute.xlu2 %37  }
  0x74   :  { %v8_v10 = vpop.permute.xlu0 %7   ;;  %v20_v11 = vpop.permute.xlu1 %19  }
  0x75   :  { %10 = vst.msk [vmem:[#allocation0] sm:$0x1] %vm9_vm1, %v8_v10  }
  0x7c   :  { %v14_v12 = vpop.permute.xlu0 %13   ;;  %v26_v13 = vpop.permute.xlu1 %25  }
  0x7d   :  { %16 = vst.msk [vmem:[#allocation0] sm:$0x1] %vm15_vm2, %v14_v12  }
  0x7e   :  { %22 = vst.msk [vmem:[#allocation0] sm:$0x1] %vm21_vm3, %v20_v11  }
  0x7f   :  { %28 = vst.msk [vmem:[#allocation0] sm:$0x1] %vm27_vm4, %v26_v13  }
  0x80   :  { %34 = vst.msk [vmem:[#allocation0] sm:$0x1] %vm33_vm5, %v32_v8  }
  0x81   :  { %40 = vst.msk [vmem:[#allocation0] sm:$0x1] %vm39_vm6, %v38_v9  }
  0x84   :  { %v44_v14 = vpop.permute.xlu0 %43  }
  0x85   :  { %46 = vst.msk [vmem:[#allocation0] sm:$0x1] %vm45_vm7, %v44_v14  }
  0x8c   :  { %v49_v15 = vld [vmem:[#allocation0] sm:$0x1] }
  0x8d   :  { %52 = vst [vmem:[%s112_s1] sm:$0x1] %v49_v15 }

// kernel: simple_cnn_forward.1
= control target key start
LH: loop header
LB: loop body
LE: loop exit
PB: predicated region body
PF: predicated region fallthrough
CT: control target
= control target key end

     0   :  { %s597_s12 = smov 0   ;;  %s760_s0 = inlined_call_operand.vmem [shape: bf16[2,16,162], index: 0, kind: input, shape index: {}]   ;;  %s761_s1 = inlined_call_operand.vmem [shape: bf16[162,256], index: 1, kind: input, shape index: {}]   ;;  %s762_s2 = inlined_call_operand.vmem [shape: f32[1,128], index: 2, kind: input, shape index: {}]   ;;  %s763_s3 = inlined_call_operand.vmem [shape: f32[2,8,128], index: 3, kind: output, shape index: {}]  }
   0x1 LB: > { %s437_s13 = sadd.s32 4294967295, %s575_s12   ;;  %p441_p0 = scmp.ge.s32.totalorder %s575_s12, 1  ;;  %s575_s12 = sphi %s597_s12, %s13_s12  }
   0x2   : > { %p137_p1 = scmp.lt.s32.totalorder %s575_s12, 3 }
   0x4   : > { %p138_p2 = pnand %p441_p0, %p137_p1 }
   0x5   : > { %p649_p3 = scmp.lt.s32.totalorder (!%p138_p2), %s437_s13, 1 }
   0x6   : > { %141 = sbr.rel (%p138_p2) target bundleno = 197 (0xc5), region = 32 }
   0xb   : > { %v511_v0 = vld [vmem:[%s761_s1 + $0x70] sm:$0xf]  ;;  %v555_v1 = vld [vmem:[%s761_s1 + $0x74] sm:$0xf0]  ;;  %v554_v2 = vld [vmem:[%s761_s1 + $0x74] sm:$0xf] }
   0xc   : > { %v512_v3 = vor.u32 %v555_v1, %v511_v0  ;;  %v513_v4 = vld [vmem:[%s761_s1 + $0x78] sm:$0xf0]  ;;  %v503_v5 = vld [vmem:[%s761_s1 + $0x60] sm:$0xf]  ;;  %v553_v6 = vld [vmem:[%s761_s1 + $0x64] sm:$0xf0] }
   0xd   : > { %v516_v7 = vor.u32 %v554_v2, %v513_v4  ;;  %v552_v8 = vld [vmem:[%s761_s1 + $0x64] sm:$0xf]  ;;  %v505_v9 = vld [vmem:[%s761_s1 + $0x68] sm:$0xf0]  ;;  %v504_v10 = vor.u32 %v553_v6, %v503_v5  ;;  %v495_v12 = vld [vmem:[%s761_s1 + $0x50] sm:$0xf] }
   0xe   : > { %318 = vmatpush.bf16.msra.mxu0 %v512_v3  ;;  %v508_v11 = vor.u32 %v552_v8, %v505_v9  ;;  %v551_v13 = vld [vmem:[%s761_s1 + $0x54] sm:$0xf0]  ;;  %v550_v14 = vld [vmem:[%s761_s1 + $0x54] sm:$0xf]  ;;  %v497_v15 = vld [vmem:[%s761_s1 + $0x58] sm:$0xf0] }
   0xf   : > { %346 = vmatpush.bf16.msra.mxu2 %v516_v7  ;;  %v192_v16 = vld [vmem:[%s761_s1 + $0xa0] sm:$0x11]  ;;  %v496_v19 = vor.u32 %v551_v13, %v495_v12  ;;  %vm311_vm0 = vcmask 1040384   ;;  %v500_v21 = vor.u32 %v550_v14, %v497_v15  ;;  %v549_v22 = vld [vmem:[%s761_s1 + $0x44] sm:$0xf0]  ;;  %s766_s13 = smov (!%p649_p3, %s437_s13), 1 }
  0x10   : > { %v264_v17 = vunpack.c.h.b16 %v192_v16  ;;  %v263_v18 = vunpack.c.l.b16 %v192_v16  ;;  %v487_v20 = vld [vmem:[%s761_s1 + $0x40] sm:$0xf]  ;;  %v558_v24 = vld [vmem:[%s761_s1 + $0x94] sm:$0xf]  ;;  %v529_v25 = vld [vmem:[%s761_s1 + $0x98] sm:$0xf0] }
  0x11   : > { %v548_v27 = vld [vmem:[%s761_s1 + $0x44] sm:$0xf]  ;;  %v489_v28 = vld [vmem:[%s761_s1 + $0x48] sm:$0xf0]  ;;  %v479_v30 = vld [vmem:[%s761_s1 + $0x30] sm:$0xf]  ;;  %v488_v34 = vor.u32 %v549_v22, %v487_v20  ;;  %v532_v37 = vor.u32 %v558_v24, %v529_v25 }
  0x12   : > { %319 = vmatpush.bf16.msra.mxu0 %v504_v10  ;;  %v286_v23 = vpack.c.b16 %v264_v17, %v264_v17  ;;  %v285_v26 = vpack.c.b16 %v263_v18, %v263_v18  ;;  %v527_v32 = vld [vmem:[%s761_s1 + $0x90] sm:$0xf]  ;;  %v559_v33 = vld [vmem:[%s761_s1 + $0x94] sm:$0xf0]  ;;  %v546_v36 = vld [vmem:[%s761_s1 + $0x34] sm:$0xf]  ;;  %v492_v38 = vor.u32 %v548_v27, %v489_v28 }
  0x13   : > { %347 = vmatpush.bf16.msra.mxu2 %v508_v11  ;;  %v547_v35 = vld [vmem:[%s761_s1 + $0x34] sm:$0xf0]  ;;  %v481_v39 = vld [vmem:[%s761_s1 + $0x38] sm:$0xf0]  ;;  %v556_v40 = vld [vmem:[%s761_s1 + $0x84] sm:$0xf]  ;;  %v528_v42 = vor.u32 %v559_v33, %v527_v32 }
  0x14   : > { %v316_v29 = vsel %vm311_vm0, %v286_v23, 0  ;;  %v313_v31 = vsel %vm311_vm0, %v285_v26, 0  ;;  %v521_v41 = vld [vmem:[%s761_s1 + $0x88] sm:$0xf0]  ;;  %s537_s17 = sshll.u32 %s766_s13, 4  ;;  %v480_v45 = vor.u32 %v547_v35, %v479_v30  ;;  %v484_v49 = vor.u32 %v546_v36, %v481_v39  ;;  %s444_s28 = sshll.u32 %s766_s13, 3 }
  0x15   : > { %365 = vmatpush.bf16.msra.mxu3 %v316_v29  ;;  %337 = vmatpush.bf16.msra.mxu1 %v313_v31  ;;  %v519_v43 = vld [vmem:[%s761_s1 + $0x80] sm:$0xf]  ;;  %v557_v44 = vld [vmem:[%s761_s1 + $0x84] sm:$0xf0]  ;;  %s708_s26 = scalar_lea.vmem %s760_s0, %s537_s17  ;;  %v524_v46 = vor.u32 %v556_v40, %v521_v41  ;;  %v544_v53 = vld [vmem:[%s761_s1 + $0x24] sm:$0xf]  ;;  %s168_s4 = scalar_lea.vmem %s763_s3, %s444_s28 }
  0x16   : > { %320 = vmatpush.bf16.msra.mxu0 %v496_v19  ;;  %v538_v47 = vld [vmem:[%s708_s26 + $0x4] sm:$0xf]  ;;  %v449_v48 = vld [vmem:[%s708_s26 + $0x8] sm:$0xf0]  ;;  %v471_v50 = vld [vmem:[%s761_s1 + $0x20] sm:$0xf]  ;;  %v520_v52 = vor.u32 %v557_v44, %v519_v43 }
  0x17   : > { %348 = vmatpush.bf16.msra.mxu2 %v500_v21  ;;  %v545_v51 = vld [vmem:[%s761_s1 + $0x24] sm:$0xf0]  ;;  %v473_v54 = vld [vmem:[%s761_s1 + $0x28] sm:$0xf0]  ;;  %v452_v55 = vor.u32 %v538_v47, %v449_v48  ;;  %vm307_vm1 = vcmask 277504  }
  0x18   : > { %v472_v56 = vor.u32 %v545_v51, %v471_v50  ;;  %v476_v57 = vor.u32 %v544_v53, %v473_v54  ;;  %v463_v58 = vld [vmem:[%s761_s1 + $0x10] sm:$0xf]  ;;  %v543_v59 = vld [vmem:[%s761_s1 + $0x14] sm:$0xf0]  ;;  %v542_v60 = vld [vmem:[%s761_s1 + $0x14] sm:$0xf] }
  0x19   : > { %366 = vmatpush.bf16.msra.mxu3 %v532_v37  ;;  %338 = vmatpush.bf16.msra.mxu1 %v528_v42  ;;  %v465_v61 = vld [vmem:[%s761_s1 + $0x18] sm:$0xf0]  ;;  %v464_v62 = vor.u32 %v543_v59, %v463_v58  ;;  %v455_v0 = vld [vmem:[%s761_s1] sm:$0xf]  ;;  %v541_v1 = vld [vmem:[%s761_s1 + $0x4] sm:$0xf0] }
  0x1a   : > { %321 = vmatpush.bf16.msra.mxu0 %v488_v34  ;;  %v468_v63 = vor.u32 %v542_v60, %v465_v61  ;;  %v540_v2 = vld [vmem:[%s761_s1 + $0x4] sm:$0xf]  ;;  %v457_v3 = vld [vmem:[%s761_s1 + $0x8] sm:$0xf0]  ;;  %v456_v4 = vor.u32 %v541_v1, %v455_v0  ;;  %v447_v5 = vld [vmem:[%s708_s26] sm:$0xf] }
  0x1b   : > { %349 = vmatpush.bf16.msra.mxu2 %v492_v38  ;;  %v539_v6 = vld [vmem:[%s708_s26 + $0x4] sm:$0xf0]  ;;  %v460_v7 = vor.u32 %v540_v2, %v457_v3  ;;  %v568_v23 = vld [vmem:[%s762_s2] ss:$0 sm:$0xff] }
  0x1c   : > { %v448_v8 = vor.u32 %v539_v6, %v447_v5 }
  0x1d   : > { %367 = vmatpush.bf16.msra.mxu3 %v524_v46  ;;  %339 = vmatpush.bf16.msra.mxu1 %v520_v52 }
  0x1e   : > { %322 = vmatpush.bf16.msra.mxu0 %v480_v45 }
  0x1f   : > { %350 = vmatpush.bf16.msra.mxu2 %v484_v49 }
  0x20   : > { %534 = vmatmul.msk.bf16.vlgmr.msra.gmra.mxu3 %vm307_vm1, %v452_v55  ;;  %533 = vmatmul.msk.bf16.vlgmr.msra.gmra.mxu1 %vm307_vm1, %v452_v55 }
  0x22   : > { %323 = vmatpush.bf16.msra.mxu0 %v472_v56 }
  0x23   : > { %351 = vmatpush.bf16.msra.mxu2 %v476_v57 }
  0x26   : > { %324 = vmatpush.bf16.msra.mxu0 %v464_v62 }
  0x27   : > { %352 = vmatpush.bf16.msra.mxu2 %v468_v63 }
  0x2a   : > { %325 = vmatpush.bf16.msra.mxu0 %v456_v4 }
  0x2b   : > { %353 = vmatpush.bf16.msra.mxu2 %v460_v7 }
  0x2d   : > { %326 = vmatmul.bf16.vlgmr.msra.gmra.mxu0 %v448_v8 }
  0x2e   : > { %354 = vmatmul.bf16.vlgmr.msra.gmra.mxu2 %v448_v8 }
  0x9d   : > { %v341_v10 = vpop.f32.mrf.mxu1 }
  0xa3   : > { %v369_v11 = vpop.f32.mrf.mxu3 }
  0xa5   : > { %v343_v15 = vpop.f32.mrf.mxu1 }
  0xaa   : > { %v327_v9 = vpop.f32.mrf.mxu0 }
  0xab   : > { %v342_v14 = vadd.f32 %v341_v10, %v327_v9  ;;  %v371_v17 = vpop.f32.mrf.mxu3 }
  0xb1   : > { %v355_v12 = vpop.f32.mrf.mxu2 }
  0xb2   : > { %v329_v13 = vpop.f32.mrf.mxu0  ;;  %v370_v16 = vadd.f32 %v369_v11, %v355_v12 }
  0xb3   : > { %v344_v19 = vadd.f32 %v343_v15, %v329_v13 }
  0xb4   : > { %v374_v21 = vmax.f32 %v342_v14, %v370_v16 }
  0xb9   : > { %v357_v18 = vpop.f32.mrf.mxu2 }
  0xba   : > { %v372_v20 = vadd.f32 %v371_v17, %v357_v18 }
  0xbc   : > { %v375_v22 = vmax.f32 %v344_v19, %v372_v20 }
  0xbe   : > { %v376_v24 = vmax.f32 %v374_v21, %v375_v22 }
  0xc0   : > { %v381_v25 = vadd.f32 %v568_v23, %v376_v24 }
  0xc2   : > { %v382_v26 = vmax.f32 %v381_v25, 0.0 }
  0xc4   : > { %383 = vst [vmem:[%s168_s4] sm:$0xff] %v382_v26 }
  0xc5 PF: > { %s13_s12 = sadd.s32 1, %s575_s12  }
  0xc6   : > { %p10_p4 = scmp.ge.s32.totalorder %s13_s12, 4  }
  0xc8   :  { %12 = sbr.rel (!%p10_p4) target bundleno = 1 (0x1), region = 62 }

</bundles_post_ra>
